<compile_context>
chip_gen: v7x
topology: tpu7x:2x2x1
jax: 0.10.0
libtpu: 0.0.40
codegen_flags: <defaults>
</compile_context>

<pallas_src>
import jax
import jax.numpy as jnp
from jax.experimental import pallas as pl
from jax.experimental.pallas import tpu as pltpu

INPUT_SIZE = 784
HIDDEN_SIZE = 512
NUM_CLASSES = 10

# Max rows of x processed per grid step (kept small enough that
# 2x double-buffered x tiles + resident bf16 weights stay well under the
# 64 MiB v7x VMEM budget; multiple of 128 for MXU-friendly M on large B).
MAX_TILE_B = 256


def _mlp_kernel(x_ref, w1_ref, b1_ref, w2_ref, b2_ref, o_ref):
    # Layer 1: (TB, 784)bf16 @ (784, 512)bf16 -> f32 acc, + bias, ReLU in f32.
    h = jnp.dot(x_ref[...], w1_ref[...], preferred_element_type=jnp.float32)
    h = jnp.maximum(h + b1_ref[...], 0.0)
    # Layer 2: cast activations to bf16 so the second matmul stays on the
    # fast bf16 MXU path; accumulate in f32.
    out = jnp.dot(h.astype(jnp.bfloat16), w2_ref[...],
                  preferred_element_type=jnp.float32)
    o_ref[...] = (out + b2_ref[...]).astype(o_ref.dtype)


def _round_up(n, m):
    return ((n + m - 1) // m) * m


def neural_net_forward(x, w1, b1, w2, b2):
    """Fused MLP forward: relu(x @ w1 + b1) @ w2 + b2.

    x:  (B, INPUT_SIZE)        float32
    w1: (INPUT_SIZE, HIDDEN)   float32   (transposed vs. PyTorch layout)
    b1: (HIDDEN,)              float32
    w2: (HIDDEN, NUM_CLASSES)  float32   (transposed vs. PyTorch layout)
    b2: (NUM_CLASSES,)         float32
    returns (B, NUM_CLASSES)   float32
    """
    B = x.shape[0]

    # bf16 operands for the MXU; f32 biases for the epilogue.
    x_bf = x.astype(jnp.bfloat16)
    w1_bf = w1.astype(jnp.bfloat16)
    w2_bf = w2.astype(jnp.bfloat16)
    b1_2d = b1.reshape(1, -1).astype(jnp.float32)
    b2_2d = b2.reshape(1, -1).astype(jnp.float32)

    # Batch tile: sublane-aligned (multiple of 8), capped for VMEM headroom.
    tile_b = min(MAX_TILE_B, _round_up(B, 8))
    grid = (pl.cdiv(B, tile_b),)

    flops = 2 * B * INPUT_SIZE * HIDDEN_SIZE + 2 * B * HIDDEN_SIZE * NUM_CLASSES
    bytes_accessed = (
        x_bf.size * 2 + w1_bf.size * 2 + w2_bf.size * 2
        + b1_2d.size * 4 + b2_2d.size * 4 + B * NUM_CLASSES * 4
    )

    return pl.pallas_call(
        _mlp_kernel,
        out_shape=jax.ShapeDtypeStruct((B, NUM_CLASSES), jnp.float32),
        grid=grid,
        in_specs=[
            # x: tiled over batch.
            pl.BlockSpec((tile_b, INPUT_SIZE), lambda i: (i, 0)),
            # Weights / biases: constant block -> resident across grid steps.
            pl.BlockSpec((INPUT_SIZE, HIDDEN_SIZE), lambda i: (0, 0)),
            pl.BlockSpec((1, HIDDEN_SIZE), lambda i: (0, 0)),
            pl.BlockSpec((HIDDEN_SIZE, NUM_CLASSES), lambda i: (0, 0)),
            pl.BlockSpec((1, NUM_CLASSES), lambda i: (0, 0)),
        ],
        out_specs=pl.BlockSpec((tile_b, NUM_CLASSES), lambda i: (i, 0)),
        compiler_params=pltpu.CompilerParams(
            dimension_semantics=("parallel",),
        ),
        cost_estimate=pl.CostEstimate(
            flops=flops, transcendentals=0, bytes_accessed=bytes_accessed),
    )(x_bf, w1_bf, b1_2d, w2_bf, b2_2d)


def _reference(x, w1, b1, w2, b2):
    # Emulate the kernel's precision path (bf16 operands, f32 accumulation).
    xb = x.astype(jnp.bfloat16)
    w1b = w1.astype(jnp.bfloat16)
    w2b = w2.astype(jnp.bfloat16)
    h = jnp.dot(xb, w1b, preferred_element_type=jnp.float32) + b1
    h = jnp.maximum(h, 0.0)
    out = jnp.dot(h.astype(jnp.bfloat16), w2b,
                  preferred_element_type=jnp.float32) + b2
    return out


if __name__ == "__main__":
    key = jax.random.PRNGKey(0)
    kx, k1, kb1, k2, kb2 = jax.random.split(key, 5)

    B = 8
    x = jax.random.normal(kx, (B, INPUT_SIZE), dtype=jnp.float32)

    # Deterministic parameter init (uniform, PyTorch-Linear-like bound).
    bound1 = 1.0 / (INPUT_SIZE ** 0.5)
    w1 = jax.random.uniform(k1, (INPUT_SIZE, HIDDEN_SIZE), jnp.float32,
                            -bound1, bound1)
    b1 = jax.random.uniform(kb1, (HIDDEN_SIZE,), jnp.float32, -bound1, bound1)

    bound2 = 1.0 / (HIDDEN_SIZE ** 0.5)
    w2 = jax.random.uniform(k2, (HIDDEN_SIZE, NUM_CLASSES), jnp.float32,
                            -bound2, bound2)
    b2 = jax.random.uniform(kb2, (NUM_CLASSES,), jnp.float32, -bound2, bound2)

    out = neural_net_forward(x, w1, b1, w2, b2)
    out = jax.block_until_ready(out)

    ref = _reference(x, w1, b1, w2, b2)
    assert out.shape == (B, NUM_CLASSES)
    assert jnp.allclose(out, ref, atol=1e-2, rtol=1e-2), "mismatch vs reference"

    print("KERNEL_OK")
</pallas_src>

<mosaic_0001>
module attributes {stable_mosaic.version = 11 : i64} {
  func.func @_mlp_kernel(%arg0: i32, %arg1: memref<8x784xbf16, #tpu.memory_space<vmem>>, %arg2: memref<784x512xbf16, #tpu.memory_space<vmem>>, %arg3: memref<1x512xf32, #tpu.memory_space<vmem>>, %arg4: memref<512x10xbf16, #tpu.memory_space<vmem>>, %arg5: memref<1x10xf32, #tpu.memory_space<vmem>>, %arg6: memref<8x10xf32, #tpu.memory_space<vmem>>) attributes {dimension_semantics = [#tpu.dimension_semantics<parallel>], iteration_bounds = array<i64: 1>, scalar_prefetch = 0 : i64, scratch_operands = 0 : i64, tpu.core_type = #tpu.core_type<tc>, window_params = [{transform_indices = @transform_0, window_bounds = array<i64: 8, 784>}, {pipeline_mode = #tpu.pipeline_mode<synchronous>, transform_indices = @transform_1, window_bounds = array<i64: 784, 512>}, {pipeline_mode = #tpu.pipeline_mode<synchronous>, transform_indices = @transform_2, window_bounds = array<i64: 1, 512>}, {pipeline_mode = #tpu.pipeline_mode<synchronous>, transform_indices = @transform_3, window_bounds = array<i64: 512, 10>}, {pipeline_mode = #tpu.pipeline_mode<synchronous>, transform_indices = @transform_4, window_bounds = array<i64: 1, 10>}, {transform_indices = @transform_5, window_bounds = array<i64: 8, 10>}]} {
    %c0 = arith.constant 0 : index
    %c0_0 = arith.constant 0 : index
    %0 = vector.load %arg1[%c0, %c0_0] : memref<8x784xbf16, #tpu.memory_space<vmem>>, vector<8x784xbf16>
    %c0_1 = arith.constant 0 : index
    %c0_2 = arith.constant 0 : index
    %1 = vector.load %arg2[%c0_1, %c0_2] : memref<784x512xbf16, #tpu.memory_space<vmem>>, vector<784x512xbf16>
    %cst = arith.constant dense<0.000000e+00> : vector<8x512xf32>
    %2 = tpu.matmul %0, %1, %cst {dimension_numbers = #tpu.dot_dimension_numbers<[1], [0], [0], [1], [0, 0, 1, 1], [], []>} : vector<8x784xbf16>, vector<784x512xbf16>, vector<8x512xf32> -> vector<8x512xf32>
    %c0_3 = arith.constant 0 : index
    %c0_4 = arith.constant 0 : index
    %3 = vector.load %arg3[%c0_3, %c0_4] : memref<1x512xf32, #tpu.memory_space<vmem>>, vector<1x512xf32>
    %4 = vector.broadcast %3 : vector<1x512xf32> to vector<8x512xf32>
    %5 = arith.addf %2, %4 : vector<8x512xf32>
    %cst_5 = arith.constant 0.000000e+00 : f32
    %6 = vector.broadcast %cst_5 : f32 to vector<8x512xf32>
    %7 = arith.maximumf %5, %6 : vector<8x512xf32>
    %8 = arith.truncf %7 : vector<8x512xf32> to vector<8x512xbf16>
    %c0_6 = arith.constant 0 : index
    %c0_7 = arith.constant 0 : index
    %9 = vector.load %arg4[%c0_6, %c0_7] : memref<512x10xbf16, #tpu.memory_space<vmem>>, vector<512x10xbf16>
    %cst_8 = arith.constant dense<0.000000e+00> : vector<8x10xf32>
    %10 = tpu.matmul %8, %9, %cst_8 {dimension_numbers = #tpu.dot_dimension_numbers<[1], [0], [0], [1], [0, 0, 1, 1], [], []>} : vector<8x512xbf16>, vector<512x10xbf16>, vector<8x10xf32> -> vector<8x10xf32>
    %c0_9 = arith.constant 0 : index
    %c0_10 = arith.constant 0 : index
    %11 = vector.load %arg5[%c0_9, %c0_10] : memref<1x10xf32, #tpu.memory_space<vmem>>, vector<1x10xf32>
    %12 = vector.broadcast %11 : vector<1x10xf32> to vector<8x10xf32>
    %13 = arith.addf %10, %12 : vector<8x10xf32>
    %c0_11 = arith.constant 0 : index
    %c0_12 = arith.constant 0 : index
    %14 = vector.load %arg6[%c0_11, %c0_12] : memref<8x10xf32, #tpu.memory_space<vmem>>, vector<8x10xf32>
    tpu.vector_store %arg6[%c0_11, %c0_12], %13 {strides = array<i32>} : memref<8x10xf32, #tpu.memory_space<vmem>>, vector<8x10xf32>,
    return
  }
  func.func @transform_0(%arg0: i32) -> (i32, i32) {
    %c0_i32 = arith.constant 0 : i32
    %c0_i32_0 = arith.constant 0 : i32
    return %arg0, %c0_i32 : i32, i32
  }
  func.func @transform_1(%arg0: i32) -> (i32, i32) {
    %c0_i32 = arith.constant 0 : i32
    %c0_i32_0 = arith.constant 0 : i32
    %c0_i32_1 = arith.constant 0 : i32
    return %c0_i32, %c0_i32_0 : i32, i32
  }
  func.func @transform_2(%arg0: i32) -> (i32, i32) {
    %c0_i32 = arith.constant 0 : i32
    %c0_i32_0 = arith.constant 0 : i32
    %c0_i32_1 = arith.constant 0 : i32
    return %c0_i32, %c0_i32_0 : i32, i32
  }
  func.func @transform_3(%arg0: i32) -> (i32, i32) {
    %c0_i32 = arith.constant 0 : i32
    %c0_i32_0 = arith.constant 0 : i32
    %c0_i32_1 = arith.constant 0 : i32
    return %c0_i32, %c0_i32_0 : i32, i32
  }
  func.func @transform_4(%arg0: i32) -> (i32, i32) {
    %c0_i32 = arith.constant 0 : i32
    %c0_i32_0 = arith.constant 0 : i32
    %c0_i32_1 = arith.constant 0 : i32
    return %c0_i32, %c0_i32_0 : i32, i32
  }
  func.func @transform_5(%arg0: i32) -> (i32, i32) {
    %c0_i32 = arith.constant 0 : i32
    %c0_i32_0 = arith.constant 0 : i32
    return %arg0, %c0_i32 : i32, i32
  }
}

</mosaic_0001>

<bundles_post_ra>
// kernel: tpu_custom_call.1
= control target key start
LH: loop header
LB: loop body
LE: loop exit
PB: predicated region body
PF: predicated region fallthrough
CT: control target
= control target key end

     0   :  { %10 = vsyncpa [#allocation3], 0  ;;  %s2843_s0 = inlined_call_operand.vmem [shape: bf16[8,784], index: 0, kind: input, shape index: {}]   ;;  %s2844_s1 = inlined_call_operand.hbm [shape: bf16[784,512], index: 1, kind: input, shape index: {}]   ;;  %s2845_s2 = inlined_call_operand.vmem [shape: f32[1,512], index: 2, kind: input, shape index: {}]   ;;  %s2846_s3 = inlined_call_operand.vmem [shape: bf16[512,10], index: 3, kind: input, shape index: {}]   ;;  %s2847_s4 = inlined_call_operand.vmem [shape: f32[1,10], index: 4, kind: input, shape index: {}]   ;;  %s2848_s5 = inlined_call_operand.hbm [shape: f32[8,10], index: 5, kind: output, shape index: {}]  }
   0x1   :  { %11 = vsyncpa [#allocation4], 0  ;;  %s2658_s18 = smov [#allocation2]   ;;  %s2610_s22 = scalar_lea.hbm %s2844_s1, 25088 }
   0x2   :  { %s19_s19 = sshll.u32 %s2658_s18, 4  ;;  %p2611_p0 = scmp.ne.s32.totalorder %s2844_s1, %s2610_s22  ;;  %s20_s19 = int_to_ptr.vmem [resolvable:$true] %s19_s19 }
   0x3   :  { %p2614_p1 = scmp.lt.u32.totalorder %s2610_s22, %s2844_s1 }
   0x5   :  { %p2616_p2 = pnand %p2614_p1, %p2611_p0 }
   0x7   :  { %2619 = shalt.err (!%p2616_p2)
}
   0x8   :  { %s2620_s27 = scalar_lea.vmem %s20_s19, 25088  ;;  %p2625_p4 = scmp.lt.s32.totalorder %s20_s19, %s20_s19 }
   0x9   :  { %p2621_p3 = scmp.ne.s32.totalorder %s20_s19, %s2620_s27  ;;  %p2626_p5 = scmp.lt.s32.totalorder %s2620_s27, %s2620_s27 }
   0xb   :  { %p2627_p6 = por %p2626_p5, %p2625_p4 }
   0xd   :  { %p2628_p7 = pnand %p2627_p6, %p2621_p3 }
   0xf   :  { %2631 = shalt.err (!%p2628_p7)
}
  0x10   :  { %s2659_s28 = smov 256   ;;  %s2660_s29 = smov 16  }
  0x11   :  { %25 = dma.hbm_to_vmem [thread:$0]  %s2844_s1, 25088, %s20_s19, [#allocation3], %s2659_s28, %s2659_s28, %s2660_s29  }
  0x12   :  { %2654 = dma.done.wait [#allocation3], 25088  }
  0x13   :  { %2655 = vsyncadd [#allocation3], 4294942208  ;;  %v2277_v0 = vld [vmem:[#allocation2 + $0x4] ss:$16 sps:$4 sm:$0xff]   ;;  %v2279_v1 = vld [vmem:[#allocation2 + $0xc] ss:$16 sps:$4 sm:$0xff]  }
  0x14   :  { %1266 = vmatprep.subr.bf16.mxu0 %v2277_v0  ;;  %v2281_v2 = vld [vmem:[#allocation2] ss:$16 sps:$4 sm:$0xff]   ;;  %v2282_v3 = vld [vmem:[#allocation2 + $0x8] ss:$16 sps:$4 sm:$0xff]   ;;  %1430 = vmatprep.subr.bf16.mxu1 %v2279_v1  ;;  %v2283_v4 = vld [vmem:[#allocation2 + $0x24] ss:$16 sps:$4 sm:$0xff]  }
  0x15   :  { %1267 = vmatpush1.bf16.msra.mxu0 %v2281_v2  ;;  %1431 = vmatpush1.bf16.msra.mxu1 %v2282_v3  ;;  %v2285_v5 = vld [vmem:[#allocation2 + $0x2c] ss:$16 sps:$4 sm:$0xff]   ;;  %v2287_v6 = vld [vmem:[#allocation2 + $0x20] ss:$16 sps:$4 sm:$0xff]   ;;  %v2288_v7 = vld [vmem:[#allocation2 + $0x28] ss:$16 sps:$4 sm:$0xff]  }
  0x16   :  { %1268 = vmatprep.subr.bf16.mxu0 %v2283_v4  ;;  %1432 = vmatprep.subr.bf16.mxu1 %v2285_v5  ;;  %v2289_v8 = vld [vmem:[#allocation2 + $0x44] ss:$16 sps:$4 sm:$0xff]   ;;  %v2291_v9 = vld [vmem:[#allocation2 + $0x4c] ss:$16 sps:$4 sm:$0xff]   ;;  %v2293_v10 = vld [vmem:[#allocation2 + $0x40] ss:$16 sps:$4 sm:$0xff]  }
  0x17   :  { %v2294_v11 = vld [vmem:[#allocation2 + $0x48] ss:$16 sps:$4 sm:$0xff]   ;;  %v2295_v12 = vld [vmem:[#allocation2 + $0x64] ss:$16 sps:$4 sm:$0xff]   ;;  %v2297_v13 = vld [vmem:[#allocation2 + $0x6c] ss:$16 sps:$4 sm:$0xff]  }
  0x18   :  { %v2299_v14 = vld [vmem:[#allocation2 + $0x60] ss:$16 sps:$4 sm:$0xff]   ;;  %v2300_v15 = vld [vmem:[#allocation2 + $0x68] ss:$16 sps:$4 sm:$0xff]   ;;  %v2301_v16 = vld [vmem:[#allocation2 + $0x84] ss:$16 sps:$4 sm:$0xff]  }
  0x19   :  { %1269 = vmatpush1.bf16.msra.mxu0 %v2287_v6  ;;  %1433 = vmatpush1.bf16.msra.mxu1 %v2288_v7  ;;  %v2303_v17 = vld [vmem:[#allocation2 + $0x8c] ss:$16 sps:$4 sm:$0xff]   ;;  %v2305_v18 = vld [vmem:[#allocation2 + $0x80] ss:$16 sps:$4 sm:$0xff]   ;;  %v2306_v19 = vld [vmem:[#allocation2 + $0x88] ss:$16 sps:$4 sm:$0xff]  }
  0x1a   :  { %1270 = vmatprep.subr.bf16.mxu0 %v2289_v8  ;;  %1434 = vmatprep.subr.bf16.mxu1 %v2291_v9  ;;  %v2307_v20 = vld [vmem:[#allocation2 + $0xa4] ss:$16 sps:$4 sm:$0xff]   ;;  %v2309_v21 = vld [vmem:[#allocation2 + $0xac] ss:$16 sps:$4 sm:$0xff]   ;;  %v2311_v22 = vld [vmem:[#allocation2 + $0xa0] ss:$16 sps:$4 sm:$0xff]  }
  0x1b   :  { %v2312_v23 = vld [vmem:[#allocation2 + $0xa8] ss:$16 sps:$4 sm:$0xff]   ;;  %v2313_v24 = vld [vmem:[#allocation2 + $0xc4] ss:$16 sps:$4 sm:$0xff]   ;;  %v2315_v25 = vld [vmem:[#allocation2 + $0xcc] ss:$16 sps:$4 sm:$0xff]  }
  0x1c   :  { %v2317_v26 = vld [vmem:[#allocation2 + $0xc0] ss:$16 sps:$4 sm:$0xff]   ;;  %v2318_v27 = vld [vmem:[#allocation2 + $0xc8] ss:$16 sps:$4 sm:$0xff]   ;;  %v2319_v28 = vld [vmem:[#allocation2 + $0xe4] ss:$16 sps:$4 sm:$0xff]  }
  0x1d   :  { %1271 = vmatpush1.bf16.msra.mxu0 %v2293_v10  ;;  %1435 = vmatpush1.bf16.msra.mxu1 %v2294_v11  ;;  %v2321_v29 = vld [vmem:[#allocation2 + $0xec] ss:$16 sps:$4 sm:$0xff]   ;;  %v2323_v30 = vld [vmem:[#allocation2 + $0xe0] ss:$16 sps:$4 sm:$0xff]   ;;  %v2324_v31 = vld [vmem:[#allocation2 + $0xe8] ss:$16 sps:$4 sm:$0xff]  }
  0x1e   :  { %1272 = vmatprep.subr.bf16.mxu0 %v2295_v12  ;;  %1436 = vmatprep.subr.bf16.mxu1 %v2297_v13  ;;  %v2325_v32 = vld [vmem:[#allocation2 + $0x104] ss:$16 sps:$4 sm:$0xff]   ;;  %v2327_v33 = vld [vmem:[#allocation2 + $0x10c] ss:$16 sps:$4 sm:$0xff]   ;;  %v2329_v34 = vld [vmem:[#allocation2 + $0x100] ss:$16 sps:$4 sm:$0xff]  }
  0x1f   :  { %v2330_v35 = vld [vmem:[#allocation2 + $0x108] ss:$16 sps:$4 sm:$0xff]   ;;  %v2331_v36 = vld [vmem:[#allocation2 + $0x124] ss:$16 sps:$4 sm:$0xff]   ;;  %v2333_v37 = vld [vmem:[#allocation2 + $0x12c] ss:$16 sps:$4 sm:$0xff]  }
  0x20   :  { %v2335_v38 = vld [vmem:[#allocation2 + $0x120] ss:$16 sps:$4 sm:$0xff]   ;;  %v2336_v39 = vld [vmem:[#allocation2 + $0x128] ss:$16 sps:$4 sm:$0xff]   ;;  %v2337_v40 = vld [vmem:[#allocation2 + $0x144] ss:$16 sps:$4 sm:$0xff]  }
  0x21   :  { %1273 = vmatpush1.bf16.msra.mxu0 %v2299_v14  ;;  %1437 = vmatpush1.bf16.msra.mxu1 %v2300_v15  ;;  %v2339_v41 = vld [vmem:[#allocation2 + $0x14c] ss:$16 sps:$4 sm:$0xff]   ;;  %v2341_v42 = vld [vmem:[#allocation2 + $0x140] ss:$16 sps:$4 sm:$0xff]   ;;  %v2342_v43 = vld [vmem:[#allocation2 + $0x148] ss:$16 sps:$4 sm:$0xff]  }
  0x22   :  { %1274 = vmatprep.subr.bf16.mxu0 %v2301_v16  ;;  %1438 = vmatprep.subr.bf16.mxu1 %v2303_v17  ;;  %v2343_v44 = vld [vmem:[#allocation2 + $0x164] ss:$16 sps:$4 sm:$0xff]   ;;  %v2345_v45 = vld [vmem:[#allocation2 + $0x16c] ss:$16 sps:$4 sm:$0xff]   ;;  %v2347_v47 = vld [vmem:[#allocation2 + $0x160] ss:$16 sps:$4 sm:$0xff]  }
  0x23   :  { %v36_v46 = vld [vmem:[%s2843_s0] sm:$0xff]  ;;  %v2348_v49 = vld [vmem:[#allocation2 + $0x168] ss:$16 sps:$4 sm:$0xff]   ;;  %v2351_v51 = vld [vmem:[#allocation2 + $0x18c] ss:$16 sps:$4 sm:$0xff]   ;;  %vm1262_vm0 = vcmask 130048  }
  0x24   :  { %v1963_v48 = vcombine.high %v36_v46, %v36_v46  ;;  %v2349_v50 = vld [vmem:[#allocation2 + $0x184] ss:$16 sps:$4 sm:$0xff]   ;;  %v2353_v52 = vld [vmem:[#allocation2 + $0x180] ss:$16 sps:$4 sm:$0xff]   ;;  %v2354_v53 = vld [vmem:[#allocation2 + $0x188] ss:$16 sps:$4 sm:$0xff]   ;;  %v1962_v4 = vcombine.low %v36_v46, %v36_v46 }
  0x25   :  { %1275 = vmatpush1.bf16.msra.mxu0 %v2305_v18  ;;  %1439 = vmatpush1.bf16.msra.mxu1 %v2306_v19  ;;  %v2355_v54 = vld [vmem:[#allocation2 + $0x1a4] ss:$16 sps:$4 sm:$0xff]   ;;  %v2357_v55 = vld [vmem:[#allocation2 + $0x1ac] ss:$16 sps:$4 sm:$0xff]   ;;  %v2359_v56 = vld [vmem:[#allocation2 + $0x1a0] ss:$16 sps:$4 sm:$0xff]  }
  0x26   :  { %1276 = vmatprep.subr.bf16.mxu0 %v2307_v20  ;;  %1440 = vmatprep.subr.bf16.mxu1 %v2309_v21  ;;  %v2360_v57 = vld [vmem:[#allocation2 + $0x1a8] ss:$16 sps:$4 sm:$0xff]   ;;  %v2361_v58 = vld [vmem:[#allocation2 + $0x1c4] ss:$16 sps:$4 sm:$0xff]   ;;  %v2363_v59 = vld [vmem:[#allocation2 + $0x1cc] ss:$16 sps:$4 sm:$0xff]  }
  0x27   :  { %1298 = vmatprep.mubr.bf16.mxu0 %v1963_v48  ;;  %1462 = vmatprep.mubr.bf16.mxu1 %v1963_v48  ;;  %v2365_v60 = vld [vmem:[#allocation2 + $0x1c0] ss:$16 sps:$4 sm:$0xff]   ;;  %v2366_v61 = vld [vmem:[#allocation2 + $0x1c8] ss:$16 sps:$4 sm:$0xff]   ;;  %v2367_v62 = vld [vmem:[#allocation2 + $0x1e4] ss:$16 sps:$4 sm:$0xff]  }
  0x28   :  { %v2369_v63 = vld [vmem:[#allocation2 + $0x1ec] ss:$16 sps:$4 sm:$0xff]   ;;  %v2371_v0 = vld [vmem:[#allocation2 + $0x1e0] ss:$16 sps:$4 sm:$0xff]   ;;  %v2372_v1 = vld [vmem:[#allocation2 + $0x1e8] ss:$16 sps:$4 sm:$0xff]  }
  0x29   :  { %1277 = vmatpush1.bf16.msra.mxu0 %v2311_v22  ;;  %1441 = vmatpush1.bf16.msra.mxu1 %v2312_v23  ;;  %v2377_v2 = vld [vmem:[#allocation2 + $0x204] ss:$16 sps:$4 sm:$0xff]   ;;  %v2380_v3 = vld [vmem:[#allocation2 + $0x20c] ss:$16 sps:$4 sm:$0xff]   ;;  %v2375_v5 = vld [vmem:[#allocation2 + $0x200] ss:$16 sps:$4 sm:$0xff]  }
  0x2a   :  { %1278 = vmatprep.subr.bf16.mxu0 %v2313_v24  ;;  %1442 = vmatprep.subr.bf16.mxu1 %v2315_v25  ;;  %v2378_v6 = vld [vmem:[#allocation2 + $0x208] ss:$16 sps:$4 sm:$0xff]   ;;  %v2383_v7 = vld [vmem:[#allocation2 + $0x224] ss:$16 sps:$4 sm:$0xff]   ;;  %v2386_v8 = vld [vmem:[#allocation2 + $0x22c] ss:$16 sps:$4 sm:$0xff]  }
  0x2b   :  { %v2381_v9 = vld [vmem:[#allocation2 + $0x220] ss:$16 sps:$4 sm:$0xff]   ;;  %v2384_v10 = vld [vmem:[#allocation2 + $0x228] ss:$16 sps:$4 sm:$0xff]   ;;  %v2389_v11 = vld [vmem:[#allocation2 + $0x244] ss:$16 sps:$4 sm:$0xff]  }
  0x2c   :  { %v2392_v12 = vld [vmem:[#allocation2 + $0x24c] ss:$16 sps:$4 sm:$0xff]   ;;  %v2387_v13 = vld [vmem:[#allocation2 + $0x240] ss:$16 sps:$4 sm:$0xff]   ;;  %v2390_v14 = vld [vmem:[#allocation2 + $0x248] ss:$16 sps:$4 sm:$0xff]  }
  0x2d   :  { %1279 = vmatpush1.bf16.msra.mxu0 %v2317_v26  ;;  %1443 = vmatpush1.bf16.msra.mxu1 %v2318_v27  ;;  %v2395_v15 = vld [vmem:[#allocation2 + $0x264] ss:$16 sps:$4 sm:$0xff]   ;;  %v2398_v16 = vld [vmem:[#allocation2 + $0x26c] ss:$16 sps:$4 sm:$0xff]   ;;  %v2393_v17 = vld [vmem:[#allocation2 + $0x260] ss:$16 sps:$4 sm:$0xff]  }
  0x2e   :  { %1280 = vmatprep.subr.bf16.mxu0 %v2319_v28  ;;  %1444 = vmatprep.subr.bf16.mxu1 %v2321_v29  ;;  %v2396_v18 = vld [vmem:[#allocation2 + $0x268] ss:$16 sps:$4 sm:$0xff]   ;;  %v2401_v19 = vld [vmem:[#allocation2 + $0x284] ss:$16 sps:$4 sm:$0xff]   ;;  %v2404_v20 = vld [vmem:[#allocation2 + $0x28c] ss:$16 sps:$4 sm:$0xff]  }
  0x2f   :  { %v2399_v21 = vld [vmem:[#allocation2 + $0x280] ss:$16 sps:$4 sm:$0xff]   ;;  %v2402_v22 = vld [vmem:[#allocation2 + $0x288] ss:$16 sps:$4 sm:$0xff]   ;;  %v2407_v23 = vld [vmem:[#allocation2 + $0x2a4] ss:$16 sps:$4 sm:$0xff]  }
  0x30   :  { %v2410_v24 = vld [vmem:[#allocation2 + $0x2ac] ss:$16 sps:$4 sm:$0xff]   ;;  %v2405_v25 = vld [vmem:[#allocation2 + $0x2a0] ss:$16 sps:$4 sm:$0xff]   ;;  %v2408_v26 = vld [vmem:[#allocation2 + $0x2a8] ss:$16 sps:$4 sm:$0xff]  }
  0x31   :  { %1281 = vmatpush1.bf16.msra.mxu0 %v2323_v30  ;;  %1445 = vmatpush1.bf16.msra.mxu1 %v2324_v31  ;;  %v2413_v27 = vld [vmem:[#allocation2 + $0x2c4] ss:$16 sps:$4 sm:$0xff]   ;;  %v2416_v28 = vld [vmem:[#allocation2 + $0x2cc] ss:$16 sps:$4 sm:$0xff]   ;;  %v2411_v31 = vld [vmem:[#allocation2 + $0x2c0] ss:$16 sps:$4 sm:$0xff]  }
  0x32   :  { %1282 = vmatprep.subr.bf16.mxu0 %v2325_v32  ;;  %1446 = vmatprep.subr.bf16.mxu1 %v2327_v33  ;;  %v2711_v29 = vld [vmem:[%s2843_s0 + $0x8] sm:$0xff]  ;;  %v2419_v33 = vld [vmem:[#allocation2 + $0x2e4] ss:$16 sps:$4 sm:$0xff]   ;;  %vm1945_vm1 = vcmask 80896  }
  0x33   :  { %v1965_v30 = vcombine.high %v2711_v29, %v2711_v29  ;;  %v2414_v32 = vld [vmem:[#allocation2 + $0x2c8] ss:$16 sps:$4 sm:$0xff]   ;;  %v2440_v46 = vld [vmem:[#allocation2 + $0x34c] ss:$16 sps:$4 sm:$0xff]  }
  0x34   :  { %v2438_v48 = vld [vmem:[#allocation2 + $0x348] ss:$16 sps:$4 sm:$0xff]  }
  0x35   :  { %1283 = vmatpush1.bf16.msra.mxu0 %v2329_v34  ;;  %1447 = vmatpush1.bf16.msra.mxu1 %v2330_v35  ;;  %v2422_v34 = vld [vmem:[#allocation2 + $0x2ec] ss:$16 sps:$4 sm:$0xff]   ;;  %v2417_v35 = vld [vmem:[#allocation2 + $0x2e0] ss:$16 sps:$4 sm:$0xff]  }
  0x36   :  { %1284 = vmatprep.subr.bf16.mxu0 %v2331_v36  ;;  %1448 = vmatprep.subr.bf16.mxu1 %v2333_v37  ;;  %v2420_v36 = vld [vmem:[#allocation2 + $0x2e8] ss:$16 sps:$4 sm:$0xff]   ;;  %v2425_v37 = vld [vmem:[#allocation2 + $0x304] ss:$16 sps:$4 sm:$0xff]  }
  0x39   :  { %1285 = vmatpush1.bf16.msra.mxu0 %v2335_v38  ;;  %1449 = vmatpush1.bf16.msra.mxu1 %v2336_v39  ;;  %v2428_v38 = vld [vmem:[#allocation2 + $0x30c] ss:$16 sps:$4 sm:$0xff]   ;;  %v2423_v39 = vld [vmem:[#allocation2 + $0x300] ss:$16 sps:$4 sm:$0xff]  }
  0x3a   :  { %1286 = vmatprep.subr.bf16.mxu0 %v2337_v40  ;;  %1450 = vmatprep.subr.bf16.mxu1 %v2339_v41  ;;  %v2426_v40 = vld [vmem:[#allocation2 + $0x308] ss:$16 sps:$4 sm:$0xff]   ;;  %v2431_v41 = vld [vmem:[#allocation2 + $0x324] ss:$16 sps:$4 sm:$0xff]  }
  0x3d   :  { %1287 = vmatpush1.bf16.msra.mxu0 %v2341_v42  ;;  %1451 = vmatpush1.bf16.msra.mxu1 %v2342_v43  ;;  %v2434_v42 = vld [vmem:[#allocation2 + $0x32c] ss:$16 sps:$4 sm:$0xff]   ;;  %v2429_v43 = vld [vmem:[#allocation2 + $0x320] ss:$16 sps:$4 sm:$0xff]  }
  0x3e   :  { %1288 = vmatprep.subr.bf16.mxu0 %v2343_v44  ;;  %1452 = vmatprep.subr.bf16.mxu1 %v2345_v45  ;;  %v2432_v44 = vld [vmem:[#allocation2 + $0x328] ss:$16 sps:$4 sm:$0xff]   ;;  %v2437_v45 = vld [vmem:[#allocation2 + $0x344] ss:$16 sps:$4 sm:$0xff]  }
  0x41   :  { %1289 = vmatpush1.bf16.msra.mxu0 %v2347_v47  ;;  %1453 = vmatpush1.bf16.msra.mxu1 %v2348_v49  ;;  %v2435_v47 = vld [vmem:[#allocation2 + $0x340] ss:$16 sps:$4 sm:$0xff]   ;;  %v2443_v49 = vld [vmem:[#allocation2 + $0x364] ss:$16 sps:$4 sm:$0xff]  }
  0x42   :  { %1290 = vmatprep.subr.bf16.mxu0 %v2349_v50  ;;  %1454 = vmatprep.subr.bf16.mxu1 %v2351_v51  ;;  %v2446_v50 = vld [vmem:[#allocation2 + $0x36c] ss:$16 sps:$4 sm:$0xff]   ;;  %v2441_v51 = vld [vmem:[#allocation2 + $0x360] ss:$16 sps:$4 sm:$0xff]  }
  0x45   :  { %1291 = vmatpush1.bf16.msra.mxu0 %v2353_v52  ;;  %1455 = vmatpush1.bf16.msra.mxu1 %v2354_v53  ;;  %v2444_v52 = vld [vmem:[#allocation2 + $0x368] ss:$16 sps:$4 sm:$0xff]   ;;  %v2449_v53 = vld [vmem:[#allocation2 + $0x384] ss:$16 sps:$4 sm:$0xff]  }
  0x46   :  { %1292 = vmatprep.subr.bf16.mxu0 %v2355_v54  ;;  %1456 = vmatprep.subr.bf16.mxu1 %v2357_v55  ;;  %v2452_v54 = vld [vmem:[#allocation2 + $0x38c] ss:$16 sps:$4 sm:$0xff]   ;;  %v2447_v55 = vld [vmem:[#allocation2 + $0x380] ss:$16 sps:$4 sm:$0xff]  }
  0x49   :  { %1293 = vmatpush1.bf16.msra.mxu0 %v2359_v56  ;;  %1457 = vmatpush1.bf16.msra.mxu1 %v2360_v57  ;;  %v2450_v56 = vld [vmem:[#allocation2 + $0x388] ss:$16 sps:$4 sm:$0xff]   ;;  %v2455_v57 = vld [vmem:[#allocation2 + $0x3a4] ss:$16 sps:$4 sm:$0xff]  }
  0x4a   :  { %1294 = vmatprep.subr.bf16.mxu0 %v2361_v58  ;;  %1458 = vmatprep.subr.bf16.mxu1 %v2363_v59  ;;  %v2458_v58 = vld [vmem:[#allocation2 + $0x3ac] ss:$16 sps:$4 sm:$0xff]   ;;  %v2453_v59 = vld [vmem:[#allocation2 + $0x3a0] ss:$16 sps:$4 sm:$0xff]  }
  0x4d   :  { %1295 = vmatpush1.bf16.msra.mxu0 %v2365_v60  ;;  %1459 = vmatpush1.bf16.msra.mxu1 %v2366_v61  ;;  %v2456_v60 = vld [vmem:[#allocation2 + $0x3a8] ss:$16 sps:$4 sm:$0xff]   ;;  %v2461_v61 = vld [vmem:[#allocation2 + $0x3c4] ss:$16 sps:$4 sm:$0xff]  }
  0x4e   :  { %1296 = vmatprep.subr.bf16.mxu0 %v2367_v62  ;;  %1460 = vmatprep.subr.bf16.mxu1 %v2369_v63  ;;  %v2464_v62 = vld [vmem:[#allocation2 + $0x3cc] ss:$16 sps:$4 sm:$0xff]   ;;  %v2459_v63 = vld [vmem:[#allocation2 + $0x3c0] ss:$16 sps:$4 sm:$0xff]  }
  0x51   :  { %1297 = vmatpush1.bf16.msra.mxu0 %v2371_v0  ;;  %1461 = vmatpush1.bf16.msra.mxu1 %v2372_v1  ;;  %v2462_v0 = vld [vmem:[#allocation2 + $0x3c8] ss:$16 sps:$4 sm:$0xff]   ;;  %v2467_v1 = vld [vmem:[#allocation2 + $0x3e4] ss:$16 sps:$4 sm:$0xff]  }
  0x52   :  { %1307 = vmatprep.subr.bf16.mxu0 %v2377_v2  ;;  %1471 = vmatprep.subr.bf16.mxu1 %v2380_v3  ;;  %v2470_v2 = vld [vmem:[#allocation2 + $0x3ec] ss:$16 sps:$4 sm:$0xff]   ;;  %v2465_v3 = vld [vmem:[#allocation2 + $0x3e0] ss:$16 sps:$4 sm:$0xff]  }
  0x54   :  { %1299 = vmatmul.mubr.bf16.vlgmr.msra.gmra.mrb[0].mxu0 %v1962_v4  ;;  %1463 = vmatmul.mubr.bf16.vlgmr.msra.gmra.mrb[0].mxu1 %v1962_v4  ;;  %v2468_v4 = vld [vmem:[#allocation2 + $0x3e8] ss:$16 sps:$4 sm:$0xff]  }
  0x55   :  { %1308 = vmatpush1.bf16.msra.mxu0 %v2375_v5  ;;  %1472 = vmatpush1.bf16.msra.mxu1 %v2378_v6  ;;  %v2475_v5 = vld [vmem:[#allocation2 + $0x404] ss:$16 sps:$4 sm:$0xff]   ;;  %v2478_v6 = vld [vmem:[#allocation2 + $0x40c] ss:$16 sps:$4 sm:$0xff]  }
  0x56   :  { %1309 = vmatprep.subr.bf16.mxu0 %v2383_v7  ;;  %1473 = vmatprep.subr.bf16.mxu1 %v2386_v8  ;;  %v1964_v7 = vcombine.low %v2711_v29, %v2711_v29  ;;  %v2473_v8 = vld [vmem:[#allocation2 + $0x400] ss:$16 sps:$4 sm:$0xff]   ;;  %v2508_v29 = vld [vmem:[#allocation2 + $0x4ac] ss:$16 sps:$4 sm:$0xff]  }
  0x57   :  { %1339 = vmatprep.mubr.bf16.mxu0 %v1965_v30  ;;  %1503 = vmatprep.mubr.bf16.mxu1 %v1965_v30  ;;  %v2503_v30 = vld [vmem:[#allocation2 + $0x4a0] ss:$16 sps:$4 sm:$0xff]  }
  0x59   :  { %1310 = vmatpush1.bf16.msra.mxu0 %v2381_v9  ;;  %1474 = vmatpush1.bf16.msra.mxu1 %v2384_v10  ;;  %v2476_v9 = vld [vmem:[#allocation2 + $0x408] ss:$16 sps:$4 sm:$0xff]   ;;  %v2481_v10 = vld [vmem:[#allocation2 + $0x424] ss:$16 sps:$4 sm:$0xff]  }
  0x5a   :  { %1311 = vmatprep.subr.bf16.mxu0 %v2389_v11  ;;  %1475 = vmatprep.subr.bf16.mxu1 %v2392_v12  ;;  %v2720_v11 = vld [vmem:[%s2843_s0 + $0x10] sm:$0xff]  ;;  %v2484_v12 = vld [vmem:[#allocation2 + $0x42c] ss:$16 sps:$4 sm:$0xff]  }
  0x5d   :  { %1312 = vmatpush1.bf16.msra.mxu0 %v2387_v13  ;;  %1476 = vmatpush1.bf16.msra.mxu1 %v2390_v14  ;;  %v1967_v13 = vcombine.high %v2720_v11, %v2720_v11  ;;  %v2479_v14 = vld [vmem:[#allocation2 + $0x420] ss:$16 sps:$4 sm:$0xff]  }
  0x5e   :  { %1313 = vmatprep.subr.bf16.mxu0 %v2395_v15  ;;  %1477 = vmatprep.subr.bf16.mxu1 %v2398_v16  ;;  %v2482_v15 = vld [vmem:[#allocation2 + $0x428] ss:$16 sps:$4 sm:$0xff]   ;;  %v2487_v16 = vld [vmem:[#allocation2 + $0x444] ss:$16 sps:$4 sm:$0xff]  }
  0x61   :  { %1314 = vmatpush1.bf16.msra.mxu0 %v2393_v17  ;;  %1478 = vmatpush1.bf16.msra.mxu1 %v2396_v18  ;;  %v2490_v17 = vld [vmem:[#allocation2 + $0x44c] ss:$16 sps:$4 sm:$0xff]   ;;  %v2485_v18 = vld [vmem:[#allocation2 + $0x440] ss:$16 sps:$4 sm:$0xff]  }
  0x62   :  { %1315 = vmatprep.subr.bf16.mxu0 %v2401_v19  ;;  %1479 = vmatprep.subr.bf16.mxu1 %v2404_v20  ;;  %v2488_v19 = vld [vmem:[#allocation2 + $0x448] ss:$16 sps:$4 sm:$0xff]   ;;  %v2493_v20 = vld [vmem:[#allocation2 + $0x464] ss:$16 sps:$4 sm:$0xff]  }
  0x65   :  { %1316 = vmatpush1.bf16.msra.mxu0 %v2399_v21  ;;  %1480 = vmatpush1.bf16.msra.mxu1 %v2402_v22  ;;  %v2496_v21 = vld [vmem:[#allocation2 + $0x46c] ss:$16 sps:$4 sm:$0xff]   ;;  %v2491_v22 = vld [vmem:[#allocation2 + $0x460] ss:$16 sps:$4 sm:$0xff]  }
  0x66   :  { %1317 = vmatprep.subr.bf16.mxu0 %v2407_v23  ;;  %1481 = vmatprep.subr.bf16.mxu1 %v2410_v24  ;;  %v2494_v23 = vld [vmem:[#allocation2 + $0x468] ss:$16 sps:$4 sm:$0xff]   ;;  %v2499_v24 = vld [vmem:[#allocation2 + $0x484] ss:$16 sps:$4 sm:$0xff]  }
  0x69   :  { %1318 = vmatpush1.bf16.msra.mxu0 %v2405_v25  ;;  %1482 = vmatpush1.bf16.msra.mxu1 %v2408_v26  ;;  %v2502_v25 = vld [vmem:[#allocation2 + $0x48c] ss:$16 sps:$4 sm:$0xff]   ;;  %v2497_v26 = vld [vmem:[#allocation2 + $0x480] ss:$16 sps:$4 sm:$0xff]  }
  0x6a   :  { %1319 = vmatprep.subr.bf16.mxu0 %v2413_v27  ;;  %1483 = vmatprep.subr.bf16.mxu1 %v2416_v28  ;;  %v2500_v27 = vld [vmem:[#allocation2 + $0x488] ss:$16 sps:$4 sm:$0xff]   ;;  %v2505_v28 = vld [vmem:[#allocation2 + $0x4a4] ss:$16 sps:$4 sm:$0xff]  }
  0x6d   :  { %1320 = vmatpush1.bf16.msra.mxu0 %v2411_v31  ;;  %1484 = vmatpush1.bf16.msra.mxu1 %v2414_v32  ;;  %v2506_v31 = vld [vmem:[#allocation2 + $0x4a8] ss:$16 sps:$4 sm:$0xff]   ;;  %v2511_v32 = vld [vmem:[#allocation2 + $0x4c4] ss:$16 sps:$4 sm:$0xff]  }
  0x6e   :  { %1321 = vmatprep.subr.bf16.mxu0 %v2419_v33  ;;  %1485 = vmatprep.subr.bf16.mxu1 %v2422_v34  ;;  %v2514_v33 = vld [vmem:[#allocation2 + $0x4cc] ss:$16 sps:$4 sm:$0xff]   ;;  %v2509_v34 = vld [vmem:[#allocation2 + $0x4c0] ss:$16 sps:$4 sm:$0xff]  }
  0x71   :  { %1322 = vmatpush1.bf16.msra.mxu0 %v2417_v35  ;;  %1486 = vmatpush1.bf16.msra.mxu1 %v2420_v36  ;;  %v2512_v35 = vld [vmem:[#allocation2 + $0x4c8] ss:$16 sps:$4 sm:$0xff]   ;;  %v2517_v36 = vld [vmem:[#allocation2 + $0x4e4] ss:$16 sps:$4 sm:$0xff]  }
  0x72   :  { %1323 = vmatprep.subr.bf16.mxu0 %v2425_v37  ;;  %1487 = vmatprep.subr.bf16.mxu1 %v2428_v38  ;;  %v2520_v37 = vld [vmem:[#allocation2 + $0x4ec] ss:$16 sps:$4 sm:$0xff]   ;;  %v2515_v38 = vld [vmem:[#allocation2 + $0x4e0] ss:$16 sps:$4 sm:$0xff]  }
  0x75   :  { %1324 = vmatpush1.bf16.msra.mxu0 %v2423_v39  ;;  %1488 = vmatpush1.bf16.msra.mxu1 %v2426_v40  ;;  %v2518_v39 = vld [vmem:[#allocation2 + $0x4e8] ss:$16 sps:$4 sm:$0xff]   ;;  %v2523_v40 = vld [vmem:[#allocation2 + $0x504] ss:$16 sps:$4 sm:$0xff]  }
  0x76   :  { %1325 = vmatprep.subr.bf16.mxu0 %v2431_v41  ;;  %1489 = vmatprep.subr.bf16.mxu1 %v2434_v42  ;;  %v2526_v41 = vld [vmem:[#allocation2 + $0x50c] ss:$16 sps:$4 sm:$0xff]   ;;  %v2521_v42 = vld [vmem:[#allocation2 + $0x500] ss:$16 sps:$4 sm:$0xff]  }
  0x79   :  { %1326 = vmatpush1.bf16.msra.mxu0 %v2429_v43  ;;  %1490 = vmatpush1.bf16.msra.mxu1 %v2432_v44  ;;  %v2524_v43 = vld [vmem:[#allocation2 + $0x508] ss:$16 sps:$4 sm:$0xff]   ;;  %v2529_v44 = vld [vmem:[#allocation2 + $0x524] ss:$16 sps:$4 sm:$0xff]  }
  0x7a   :  { %1327 = vmatprep.subr.bf16.mxu0 %v2437_v45  ;;  %1491 = vmatprep.subr.bf16.mxu1 %v2440_v46  ;;  %v2532_v45 = vld [vmem:[#allocation2 + $0x52c] ss:$16 sps:$4 sm:$0xff]   ;;  %v2527_v46 = vld [vmem:[#allocation2 + $0x520] ss:$16 sps:$4 sm:$0xff]  }
  0x7d   :  { %1328 = vmatpush1.bf16.msra.mxu0 %v2435_v47  ;;  %1492 = vmatpush1.bf16.msra.mxu1 %v2438_v48  ;;  %v2530_v47 = vld [vmem:[#allocation2 + $0x528] ss:$16 sps:$4 sm:$0xff]   ;;  %v2535_v48 = vld [vmem:[#allocation2 + $0x544] ss:$16 sps:$4 sm:$0xff]  }
  0x7e   :  { %1329 = vmatprep.subr.bf16.mxu0 %v2443_v49  ;;  %1493 = vmatprep.subr.bf16.mxu1 %v2446_v50  ;;  %v2538_v49 = vld [vmem:[#allocation2 + $0x54c] ss:$16 sps:$4 sm:$0xff]   ;;  %v2533_v50 = vld [vmem:[#allocation2 + $0x540] ss:$16 sps:$4 sm:$0xff]  }
  0x81   :  { %1330 = vmatpush1.bf16.msra.mxu0 %v2441_v51  ;;  %1494 = vmatpush1.bf16.msra.mxu1 %v2444_v52  ;;  %v2536_v51 = vld [vmem:[#allocation2 + $0x548] ss:$16 sps:$4 sm:$0xff]   ;;  %v2541_v52 = vld [vmem:[#allocation2 + $0x564] ss:$16 sps:$4 sm:$0xff]  }
  0x82   :  { %1331 = vmatprep.subr.bf16.mxu0 %v2449_v53  ;;  %1495 = vmatprep.subr.bf16.mxu1 %v2452_v54  ;;  %v2544_v53 = vld [vmem:[#allocation2 + $0x56c] ss:$16 sps:$4 sm:$0xff]   ;;  %v2539_v54 = vld [vmem:[#allocation2 + $0x560] ss:$16 sps:$4 sm:$0xff]  }
  0x85   :  { %1332 = vmatpush1.bf16.msra.mxu0 %v2447_v55  ;;  %1496 = vmatpush1.bf16.msra.mxu1 %v2450_v56  ;;  %v2542_v55 = vld [vmem:[#allocation2 + $0x568] ss:$16 sps:$4 sm:$0xff]   ;;  %v2547_v56 = vld [vmem:[#allocation2 + $0x584] ss:$16 sps:$4 sm:$0xff]  }
  0x86   :  { %1333 = vmatprep.subr.bf16.mxu0 %v2455_v57  ;;  %1497 = vmatprep.subr.bf16.mxu1 %v2458_v58  ;;  %v2550_v57 = vld [vmem:[#allocation2 + $0x58c] ss:$16 sps:$4 sm:$0xff]   ;;  %v2545_v58 = vld [vmem:[#allocation2 + $0x580] ss:$16 sps:$4 sm:$0xff]  }
  0x89   :  { %1334 = vmatpush1.bf16.msra.mxu0 %v2453_v59  ;;  %1498 = vmatpush1.bf16.msra.mxu1 %v2456_v60  ;;  %v2548_v59 = vld [vmem:[#allocation2 + $0x588] ss:$16 sps:$4 sm:$0xff]   ;;  %v2553_v60 = vld [vmem:[#allocation2 + $0x5a4] ss:$16 sps:$4 sm:$0xff]  }
  0x8a   :  { %1335 = vmatprep.subr.bf16.mxu0 %v2461_v61  ;;  %1499 = vmatprep.subr.bf16.mxu1 %v2464_v62  ;;  %v2556_v61 = vld [vmem:[#allocation2 + $0x5ac] ss:$16 sps:$4 sm:$0xff]   ;;  %v2551_v62 = vld [vmem:[#allocation2 + $0x5a0] ss:$16 sps:$4 sm:$0xff]  }
  0x8d   :  { %1336 = vmatpush1.bf16.msra.mxu0 %v2459_v63  ;;  %1500 = vmatpush1.bf16.msra.mxu1 %v2462_v0  ;;  %v2554_v63 = vld [vmem:[#allocation2 + $0x5a8] ss:$16 sps:$4 sm:$0xff]   ;;  %v2559_v0 = vld [vmem:[#allocation2 + $0x5c4] ss:$16 sps:$4 sm:$0xff]  }
  0x8e   :  { %1337 = vmatprep.subr.bf16.mxu0 %v2467_v1  ;;  %1501 = vmatprep.subr.bf16.mxu1 %v2470_v2  ;;  %v2562_v1 = vld [vmem:[#allocation2 + $0x5cc] ss:$16 sps:$4 sm:$0xff]   ;;  %v2557_v2 = vld [vmem:[#allocation2 + $0x5c0] ss:$16 sps:$4 sm:$0xff]  }
  0x91   :  { %1338 = vmatpush1.bf16.msra.mxu0 %v2465_v3  ;;  %1502 = vmatpush1.bf16.msra.mxu1 %v2468_v4  ;;  %v2560_v3 = vld [vmem:[#allocation2 + $0x5c8] ss:$16 sps:$4 sm:$0xff]   ;;  %v2565_v4 = vld [vmem:[#allocation2 + $0x5e4] ss:$16 sps:$4 sm:$0xff]  }
  0x92   :  { %1348 = vmatprep.subr.bf16.mxu0 %v2475_v5  ;;  %1512 = vmatprep.subr.bf16.mxu1 %v2478_v6  ;;  %v2568_v5 = vld [vmem:[#allocation2 + $0x5ec] ss:$16 sps:$4 sm:$0xff]   ;;  %v2563_v6 = vld [vmem:[#allocation2 + $0x5e0] ss:$16 sps:$4 sm:$0xff]  }
  0x94   :  { %1340 = vmatmul.mubr.bf16.vlgmr.msra.gmra.mrb[0].mxu0 %v1964_v7  ;;  %1504 = vmatmul.mubr.bf16.vlgmr.msra.gmra.mrb[0].mxu1 %v1964_v7  ;;  %v2566_v7 = vld [vmem:[#allocation2 + $0x5e8] ss:$16 sps:$4 sm:$0xff]  }
  0x95   :  { %1349 = vmatpush1.bf16.msra.mxu0 %v2473_v8  ;;  %1513 = vmatpush1.bf16.msra.mxu1 %v2476_v9  ;;  %v2573_v8 = vld [vmem:[#allocation2 + $0x604] ss:$16 sps:$4 sm:$0xff]   ;;  %v2576_v9 = vld [vmem:[#allocation2 + $0x60c] ss:$16 sps:$4 sm:$0xff]  }
  0x96   :  { %1350 = vmatprep.subr.bf16.mxu0 %v2481_v10  ;;  %1514 = vmatprep.subr.bf16.mxu1 %v2484_v12  ;;  %v1966_v10 = vcombine.low %v2720_v11, %v2720_v11  ;;  %v2571_v12 = vld [vmem:[#allocation2 + $0x600] ss:$16 sps:$4 sm:$0xff]   ;;  %v2577_v11 = vld [vmem:[%s2843_s0 + $0x18] ss:$0 sps:$4 sm:$0xff]   ;;  %s2662_s0 = smov [#allocation5]  }
  0x97   :  { %1380 = vmatprep.mubr.bf16.mxu0 %v1967_v13  ;;  %1544 = vmatprep.mubr.bf16.mxu1 %v1967_v13  ;;  %v2574_v13 = vld [vmem:[#allocation2 + $0x608] ss:$16 sps:$4 sm:$0xff]   ;;  %s1953_s26 = sshll.u32 %s2662_s0, 4  ;;  %s1954_s26 = int_to_ptr.vmem [resolvable:$true] %s1953_s26 }
  0x98   :  { %s2632_s27 = scalar_lea.vmem %s1954_s26, 128  ;;  %p2637_p9 = scmp.lt.s32.totalorder %s1954_s26, %s1954_s26 }
  0x99   :  { %1351 = vmatpush1.bf16.msra.mxu0 %v2479_v14  ;;  %1515 = vmatpush1.bf16.msra.mxu1 %v2482_v15  ;;  %v2578_v14 = vld [vmem:[%s2846_s3 + $0x40] sm:$0xff]   ;;  %p2633_p8 = scmp.ne.s32.totalorder %s1954_s26, %s2632_s27  ;;  %p2638_p10 = scmp.lt.s32.totalorder %s2632_s27, %s2632_s27 }
  0x9a   :  { %1352 = vmatprep.subr.bf16.mxu0 %v2487_v16  ;;  %1516 = vmatprep.subr.bf16.mxu1 %v2490_v17  ;;  %v2579_v15 = vld [vmem:[%s2846_s3 + $0xc0] sm:$0xff]   ;;  %v2661_v16 = vmov 0  }
  0x9b   :  { %v2580_v17 = vld [vmem:[%s2846_s3] sm:$0xff]   ;;  %p2639_p11 = por %p2638_p10, %p2637_p9 }
  0x9d   :  { %1353 = vmatpush1.bf16.msra.mxu0 %v2485_v18  ;;  %1517 = vmatpush1.bf16.msra.mxu1 %v2488_v19  ;;  %v2581_v18 = vld [vmem:[%s2846_s3 + $0x80] sm:$0xff]   ;;  %v2582_v19 = vld [vmem:[%s2846_s3 + $0x48] sm:$0xff]   ;;  %p2640_p12 = pnand %p2639_p11, %p2633_p8 }
  0x9e   :  { %1354 = vmatprep.subr.bf16.mxu0 %v2493_v20  ;;  %1518 = vmatprep.subr.bf16.mxu1 %v2496_v21  ;;  %v2583_v20 = vld [vmem:[%s2846_s3 + $0xc8] sm:$0xff]  }
  0x9f   :  { %v2584_v21 = vld [vmem:[%s2846_s3 + $0x8] sm:$0xff]  }
  0xa1   :  { %1355 = vmatpush1.bf16.msra.mxu0 %v2491_v22  ;;  %1519 = vmatpush1.bf16.msra.mxu1 %v2494_v23  ;;  %v2585_v22 = vld [vmem:[%s2846_s3 + $0x88] sm:$0xff]   ;;  %v2586_v23 = vld [vmem:[%s2846_s3 + $0x50] sm:$0xff]  }
  0xa2   :  { %1356 = vmatprep.subr.bf16.mxu0 %v2499_v24  ;;  %1520 = vmatprep.subr.bf16.mxu1 %v2502_v25  ;;  %v2587_v24 = vld [vmem:[%s2846_s3 + $0xd0] sm:$0xff]  }
  0xa3   :  { %v2588_v25 = vld [vmem:[%s2846_s3 + $0x10] sm:$0xff]  }
  0xa5   :  { %1357 = vmatpush1.bf16.msra.mxu0 %v2497_v26  ;;  %1521 = vmatpush1.bf16.msra.mxu1 %v2500_v27  ;;  %v2589_v26 = vld [vmem:[%s2846_s3 + $0x90] sm:$0xff]   ;;  %v2590_v27 = vld [vmem:[%s2846_s3 + $0x58] sm:$0xff]  }
  0xa6   :  { %1358 = vmatprep.subr.bf16.mxu0 %v2505_v28  ;;  %1522 = vmatprep.subr.bf16.mxu1 %v2508_v29  ;;  %v2591_v28 = vld [vmem:[%s2846_s3 + $0xd8] sm:$0xff]  }
  0xa7   :  { %v2592_v29 = vld [vmem:[%s2846_s3 + $0x18] sm:$0xff]  }
  0xa9   :  { %1359 = vmatpush1.bf16.msra.mxu0 %v2503_v30  ;;  %1523 = vmatpush1.bf16.msra.mxu1 %v2506_v31  ;;  %v2593_v30 = vld [vmem:[%s2846_s3 + $0x98] sm:$0xff]   ;;  %v2594_v31 = vld [vmem:[%s2846_s3 + $0x60] sm:$0xff]  }
  0xaa   :  { %1360 = vmatprep.subr.bf16.mxu0 %v2511_v32  ;;  %1524 = vmatprep.subr.bf16.mxu1 %v2514_v33  ;;  %v2595_v32 = vld [vmem:[%s2846_s3 + $0xe0] sm:$0xff]  }
  0xab   :  { %v2596_v33 = vld [vmem:[%s2846_s3 + $0x20] sm:$0xff]  }
  0xad   :  { %1361 = vmatpush1.bf16.msra.mxu0 %v2509_v34  ;;  %1525 = vmatpush1.bf16.msra.mxu1 %v2512_v35  ;;  %v2597_v34 = vld [vmem:[%s2846_s3 + $0xa0] sm:$0xff]   ;;  %v2598_v35 = vld [vmem:[%s2846_s3 + $0x68] sm:$0xff]  }
  0xae   :  { %1362 = vmatprep.subr.bf16.mxu0 %v2517_v36  ;;  %1526 = vmatprep.subr.bf16.mxu1 %v2520_v37  ;;  %v2599_v36 = vld [vmem:[%s2846_s3 + $0xe8] sm:$0xff]  }
  0xaf   :  { %v2600_v37 = vld [vmem:[%s2846_s3 + $0x28] sm:$0xff]  }
  0xb1   :  { %1363 = vmatpush1.bf16.msra.mxu0 %v2515_v38  ;;  %1527 = vmatpush1.bf16.msra.mxu1 %v2518_v39  ;;  %v2601_v38 = vld [vmem:[%s2846_s3 + $0xa8] sm:$0xff]   ;;  %v2602_v39 = vld [vmem:[%s2846_s3 + $0x70] sm:$0xff]  }
  0xb2   :  { %1364 = vmatprep.subr.bf16.mxu0 %v2523_v40  ;;  %1528 = vmatprep.subr.bf16.mxu1 %v2526_v41  ;;  %v2603_v40 = vld [vmem:[%s2846_s3 + $0xf0] sm:$0xff]  }
  0xb3   :  { %v2604_v41 = vld [vmem:[%s2846_s3 + $0x30] sm:$0xff]  }
  0xb5   :  { %1365 = vmatpush1.bf16.msra.mxu0 %v2521_v42  ;;  %1529 = vmatpush1.bf16.msra.mxu1 %v2524_v43  ;;  %v2605_v42 = vld [vmem:[%s2846_s3 + $0xb0] sm:$0xff]   ;;  %v2606_v43 = vld [vmem:[%s2846_s3 + $0x78] sm:$0xff]  }
  0xb6   :  { %1366 = vmatprep.subr.bf16.mxu0 %v2529_v44  ;;  %1530 = vmatprep.subr.bf16.mxu1 %v2532_v45  ;;  %v2607_v44 = vld [vmem:[%s2846_s3 + $0xf8] sm:$0xff]  }
  0xb7   :  { %v2608_v45 = vld [vmem:[%s2846_s3 + $0x38] sm:$0xff]  }
  0xb9   :  { %1367 = vmatpush1.bf16.msra.mxu0 %v2527_v46  ;;  %1531 = vmatpush1.bf16.msra.mxu1 %v2530_v47  ;;  %v2609_v46 = vld [vmem:[%s2846_s3 + $0xb8] sm:$0xff]   ;;  %v238_v47 = vlaneseq }
  0xba   :  { %1368 = vmatprep.subr.bf16.mxu0 %v2535_v48  ;;  %1532 = vmatprep.subr.bf16.mxu1 %v2538_v49 }
  0xbb   :  { %v239_v48 = vshrl.u32 %v238_v47, 7 }
  0xbd   :  { %1369 = vmatpush1.bf16.msra.mxu0 %v2533_v50  ;;  %1533 = vmatpush1.bf16.msra.mxu1 %v2536_v51  ;;  %v240_v49 = vsub.s32 0, %v239_v48  ;;  %v248_v50 = vsub.s32 2, %v239_v48  ;;  %v236_v51 = vld [vmem:[%s2845_s2] sm:$0xf] }
  0xbe   :  { %1370 = vmatprep.subr.bf16.mxu0 %v2541_v52  ;;  %1534 = vmatprep.subr.bf16.mxu1 %v2544_v53  ;;  %v244_v52 = vsub.s32 1, %v239_v48  ;;  %v252_v53 = vsub.s32 3, %v239_v48 }
  0xc1   :  { %1371 = vmatpush1.bf16.msra.mxu0 %v2539_v54  ;;  %1535 = vmatpush1.bf16.msra.mxu1 %v2542_v55  ;;  %v241_v54 = vrot.slane %v236_v51, %v240_v49  ;;  %v249_v55 = vrot.slane %v236_v51, %v248_v50 }
  0xc2   :  { %1372 = vmatprep.subr.bf16.mxu0 %v2547_v56  ;;  %1536 = vmatprep.subr.bf16.mxu1 %v2550_v57  ;;  %v245_v56 = vrot.slane %v236_v51, %v244_v52  ;;  %v253_v57 = vrot.slane %v236_v51, %v252_v53 }
  0xc5   :  { %1373 = vmatpush1.bf16.msra.mxu0 %v2545_v58  ;;  %1537 = vmatpush1.bf16.msra.mxu1 %v2548_v59 }
  0xc6   :  { %1374 = vmatprep.subr.bf16.mxu0 %v2553_v60  ;;  %1538 = vmatprep.subr.bf16.mxu1 %v2556_v61 }
  0xc9   :  { %1375 = vmatpush1.bf16.msra.mxu0 %v2551_v62  ;;  %1539 = vmatpush1.bf16.msra.mxu1 %v2554_v63 }
  0xca   :  { %1376 = vmatprep.subr.bf16.mxu0 %v2559_v0  ;;  %1540 = vmatprep.subr.bf16.mxu1 %v2562_v1 }
  0xcd   :  { %1377 = vmatpush1.bf16.msra.mxu0 %v2557_v2  ;;  %1541 = vmatpush1.bf16.msra.mxu1 %v2560_v3 }
  0xce   :  { %1378 = vmatprep.subr.bf16.mxu0 %v2565_v4  ;;  %1542 = vmatprep.subr.bf16.mxu1 %v2568_v5 }
  0xd1   :  { %1379 = vmatpush1.bf16.msra.mxu0 %v2563_v6  ;;  %1543 = vmatpush1.bf16.msra.mxu1 %v2566_v7 }
  0xd2   :  { %1389 = vmatprep.subr.bf16.mxu0 %v2573_v8  ;;  %1553 = vmatprep.subr.bf16.mxu1 %v2576_v9 }
  0xd4   :  { %1381 = vmatmul.mubr.bf16.vlgmr.msra.gmra.mrb[0].mxu0 %v1966_v10  ;;  %1545 = vmatmul.mubr.bf16.vlgmr.msra.gmra.mrb[0].mxu1 %v1966_v10 }
  0xd5   :  { %1390 = vmatpush1.bf16.msra.mxu0 %v2571_v12  ;;  %1554 = vmatpush1.bf16.msra.mxu1 %v2574_v13 }
  0xd6   :  { %1421 = vmatprep.mubr.bf16.mxu0 %v2661_v16  ;;  %1585 = vmatprep.mubr.bf16.mxu1 %v2661_v16 }
  0xd7   :  { %2200 = vmatprep.subr.bf16.mxu0 %v2578_v14  ;;  %2222 = vmatprep.subr.bf16.mxu1 %v2579_v15 }
  0xe0   :  { %2165 = vmatmul.mubr.msk.bf16.vlgmr.msra.gmra.mrb[0].mxu0 %vm1262_vm0, %v2577_v11  ;;  %2166 = vmatmul.mubr.msk.bf16.vlgmr.msra.gmra.mrb[0].mxu1 %vm1262_vm0, %v2577_v11  ;;  %v2167_v11 = vld [vmem:[%s2847_s4] ss:$0 sm:$0xff] }
  0xe1   :  { %2201 = vmatpush3.bf16.msra.mxu0 %v2580_v17  ;;  %2223 = vmatpush3.bf16.msra.mxu1 %v2581_v18 }
  0xe2   :  { %2202 = vmatprep.subr.bf16.mxu0 %v2582_v19  ;;  %2224 = vmatprep.subr.bf16.mxu1 %v2583_v20 }
  0xe5   :  { %2203 = vmatpush3.bf16.msra.mxu0 %v2584_v21  ;;  %2225 = vmatpush3.bf16.msra.mxu1 %v2585_v22 }
  0xe6   :  { %2204 = vmatprep.subr.bf16.mxu0 %v2586_v23  ;;  %2226 = vmatprep.subr.bf16.mxu1 %v2587_v24 }
  0xe9   :  { %2205 = vmatpush3.bf16.msra.mxu0 %v2588_v25  ;;  %2227 = vmatpush3.bf16.msra.mxu1 %v2589_v26 }
  0xea   :  { %2206 = vmatprep.subr.bf16.mxu0 %v2590_v27  ;;  %2228 = vmatprep.subr.bf16.mxu1 %v2591_v28 }
  0xed   :  { %2207 = vmatpush3.bf16.msra.mxu0 %v2592_v29  ;;  %2229 = vmatpush3.bf16.msra.mxu1 %v2593_v30 }
  0xee   :  { %2208 = vmatprep.subr.bf16.mxu0 %v2594_v31  ;;  %2230 = vmatprep.subr.bf16.mxu1 %v2595_v32 }
  0xf1   :  { %2209 = vmatpush3.bf16.msra.mxu0 %v2596_v33  ;;  %2231 = vmatpush3.bf16.msra.mxu1 %v2597_v34 }
  0xf2   :  { %2210 = vmatprep.subr.bf16.mxu0 %v2598_v35  ;;  %2232 = vmatprep.subr.bf16.mxu1 %v2599_v36 }
  0xf5   :  { %2211 = vmatpush3.bf16.msra.mxu0 %v2600_v37  ;;  %2233 = vmatpush3.bf16.msra.mxu1 %v2601_v38 }
  0xf6   :  { %2212 = vmatprep.subr.bf16.mxu0 %v2602_v39  ;;  %2234 = vmatprep.subr.bf16.mxu1 %v2603_v40 }
  0xf9   :  { %2213 = vmatpush3.bf16.msra.mxu0 %v2604_v41  ;;  %2235 = vmatpush3.bf16.msra.mxu1 %v2605_v42 }
  0xfa   :  { %2214 = vmatprep.subr.bf16.mxu0 %v2606_v43  ;;  %2236 = vmatprep.subr.bf16.mxu1 %v2607_v44 }
  0xfd   :  { %2215 = vmatpush3.bf16.msra.mxu0 %v2608_v45  ;;  %2237 = vmatpush3.bf16.msra.mxu1 %v2609_v46 }
 0x1b3   :  { %v1423_v58 = vpop.f32.mrb[0].mxu0  ;;  %v1587_v59 = vpop.f32.mrb[0].mxu1 }
 0x1b4   :  { %v2244_v60 = vadd.f32 %v1423_v58, %v241_v54  ;;  %v2246_v61 = vadd.f32 %v1587_v59, %v249_v55  ;;  %v1425_v62 = vpop.f32.mrb[1].mxu0  ;;  %v1589_v63 = vpop.f32.mrb[1].mxu1 }
 0x1b5   :  { %v2245_v0 = vadd.f32 %v1425_v62, %v245_v56  ;;  %v2247_v1 = vadd.f32 %v1589_v63, %v253_v57  ;;  %v1427_v2 = vpop.f32.mrb[2].mxu0  ;;  %v1591_v3 = vpop.f32.mrb[2].mxu1 }
 0x1b6   :  { %v1594_v4 = vmax.f32 %v2244_v60, 0.0  ;;  %v1596_v5 = vmax.f32 %v2246_v61, 0.0  ;;  %v1428_v6 = vpop.f32.mrb[3].mxu0  ;;  %v1592_v7 = vpop.f32.mrb[3].mxu1 }
 0x1b7   :  { %v1595_v8 = vmax.f32 %v2245_v0, 0.0  ;;  %v1597_v9 = vmax.f32 %v2247_v1, 0.0 }
 0x1b8   :  { %v1598_v13 = vpack.c.bf16 %v1594_v4, %v1594_v4  ;;  %v1600_v14 = vpack.c.bf16 %v1596_v5, %v1596_v5 }
 0x1b9   :  { %v1599_v10 = vpack.c.bf16 %v1595_v8, %v1595_v8  ;;  %v1601_v12 = vpack.c.bf16 %v1597_v9, %v1597_v9 }
 0x1bb   :  { %1897 = vmatprep.mubr.bf16.mxu0 %v1599_v10  ;;  %1937 = vmatprep.mubr.bf16.mxu1 %v1601_v12 }
 0x1bc   :  { %1898 = vmatmul.mubr.bf16.vlgmr.msra.gmra.mrb[4].mxu0 %v1598_v13  ;;  %1938 = vmatmul.mubr.bf16.vlgmr.msra.gmra.mrb[4].mxu1 %v1600_v14 }
 0x28f   :  { %v2216_v15 = vpop.f32.mrb[4].mxu0  ;;  %v2238_v16 = vpop.f32.mrb[4].mxu1 }
 0x290   :  { %v2217_v17 = vpop.f32.mrb[5].mxu0  ;;  %v2239_v18 = vpop.f32.mrb[5].mxu1 }
 0x291   :  { %v2218_v19 = vadd.f32 %v2217_v17, %v2216_v15  ;;  %v2240_v20 = vadd.f32 %v2239_v18, %v2238_v16  ;;  %v2219_v21 = vpop.f32.mrb[6].mxu0  ;;  %v2241_v22 = vpop.f32.mrb[6].mxu1 }
 0x292   :  { %v2220_v23 = vpop.f32.mrb[7].mxu0  ;;  %v2242_v24 = vpop.f32.mrb[7].mxu1 }
 0x293   :  { %v1900_v25 = vadd.f32 %v2218_v19, %v2167_v11 }
 0x295   :  { %v1940_v26 = vadd.f32 %v2240_v20, %v1900_v25 }
 0x297   :  { %1946 = vst.msk [vmem:[#allocation5] sm:$0xff] %vm1945_vm1, %v1940_v26 }
 0x298   :  { %2643 = shalt.err (!%p2640_p12)
}
 0x299   :  { %s2644_s29 = scalar_lea.hbm %s2848_s5, 128 }
 0x29a   :  { %p2645_p13 = scmp.ne.s32.totalorder %s2848_s5, %s2644_s29  ;;  %p2648_p0 = scmp.lt.u32.totalorder %s2644_s29, %s2848_s5 }
 0x29c   :  { %p2650_p1 = pnand %p2648_p0, %p2645_p13 }
 0x29e   :  { %2653 = shalt.err (!%p2650_p1)
}
 0x29f   :  { %1956 = dma.vmem_to_hbm [thread:$0]  %s1954_s26, 128, %s2848_s5, [#allocation4]  }
 0x2a0   :  { %2656 = dma.done.wait [#allocation4], 128  }
 0x2a1   :  { %2657 = vsyncadd [#allocation4], 4294967168 }
 0x2a2   :  { %1960 = vsyncpa [#allocation3], 1 }
 0x2a3   :  { %1961 = vsyncpa [#allocation4], 1 }

</bundles_post_ra>
